<compile_context>
chip_gen: v7x
topology: tpu7x:2x2x1
jax: 0.10.0
libtpu: 0.0.40
codegen_flags: <defaults>
</compile_context>

<pallas_src>
import functools

import jax
import jax.numpy as jnp
import numpy as np
from jax.experimental import pallas as pl
from jax.experimental.pallas import tpu as pltpu


def conv3x3_relu_kernel(x_ref, w_ref, b_ref, m_ref, o_ref, *, width):
    # x_ref: (1, Cin, HW)   one batch element, spatial flattened onto lanes
    # w_ref: (Cout, 9*Cin)  taps flattened in (ky, kx, ci) order
    # b_ref: (Cout, 1)
    # m_ref: (9, HW)        f32 validity mask per tap (implements padding=1)
    # o_ref: (1, Cout, HW)
    x = x_ref[0]                                            # (Cin, HW)

    taps = []
    for ky in range(3):
        for kx in range(3):
            dy, dx = ky - 1, kx - 1
            s = dy * width + dx                             # flat spatial shift
            if s == 0:                                      # centre tap: as-is
                taps.append(x)
                continue
            # shifted[:, i] == x[:, i + s] for every in-bounds tap position;
            # out-of-bounds (halo) positions are zeroed by the mask.
            shifted = jnp.roll(x, -s, axis=1)               # lane rotate (XLU)
            k = ky * 3 + kx
            mask = m_ref[k:k + 1, :]                        # (1, HW)
            taps.append(shifted * mask)

    patches = jnp.concatenate(taps, axis=0)                 # (9*Cin, HW)
    # Single fat MXU matmul, f32 accumulation, lane-dense (Cout, HW) result.
    acc = jnp.dot(w_ref[...], patches,
                  preferred_element_type=jnp.float32)       # (Cout, HW)
    acc = acc + b_ref[...]                                  # bias (Cout, 1)
    acc = jnp.maximum(acc, 0.0)                             # ReLU
    o_ref[0] = acc.astype(o_ref.dtype)


def _tap_masks(H, W):
    """(9, H*W) float32 validity masks for a 3x3 / pad=1 conv (host-side)."""
    hh, ww = np.meshgrid(np.arange(H), np.arange(W), indexing="ij")
    rows = []
    for ky in range(3):
        for kx in range(3):
            dy, dx = ky - 1, kx - 1
            ok = ((hh + dy >= 0) & (hh + dy < H) &
                  (ww + dx >= 0) & (ww + dx < W))
            rows.append(ok.reshape(-1))
    return np.stack(rows).astype(np.float32)


def conv_relu(x_nchw, weight, bias):
    """ConvRelu forward. x_nchw: (N,Cin,H,W); weight: (Cout,Cin,3,3); bias: (Cout,)."""
    N, Cin, H, W = x_nchw.shape
    Cout = weight.shape[0]
    HW = H * W

    x_flat = x_nchw.reshape(N, Cin, HW)          # free reshape, stays NCHW-contiguous
    # (Cout, Cin, 3, 3) -> (Cout, 3, 3, Cin) -> (Cout, 9*Cin); tiny (Cout*Cin*9 floats).
    w_flat = jnp.transpose(weight, (0, 2, 3, 1)).reshape(Cout, 9 * Cin)
    b_col = bias.reshape(Cout, 1)
    tap_mask = jnp.asarray(_tap_masks(H, W))     # (9, HW), constant wrt. data

    kernel = functools.partial(conv3x3_relu_kernel, width=W)

    out_flat = pl.pallas_call(
        kernel,
        out_shape=jax.ShapeDtypeStruct((N, Cout, HW), x_nchw.dtype),
        grid_spec=pltpu.PrefetchScalarGridSpec(
            num_scalar_prefetch=0,
            # Parallel batch axis: v7x's 2 TensorCores take one image each.
            # (On single-TC v5e/v6e this is measured-neutral; per-step overhead
            #  is ~0.35us for the 2-step grid.)
            grid=(N,),
            in_specs=[
                pl.BlockSpec((1, Cin, HW), lambda n: (n, 0, 0)),
                pl.BlockSpec((Cout, 9 * Cin), lambda n: (0, 0)),
                pl.BlockSpec((Cout, 1), lambda n: (0, 0)),
                pl.BlockSpec((9, HW), lambda n: (0, 0)),
            ],
            out_specs=pl.BlockSpec((1, Cout, HW), lambda n: (n, 0, 0)),
        ),
        compiler_params=pltpu.CompilerParams(
            dimension_semantics=("parallel",)),
    )(x_flat, w_flat, b_col, tap_mask)

    return out_flat.reshape(N, Cout, H, W)       # free reshape back to NCHW


if __name__ == "__main__":
    # Module: ConvRelu(_in=4, _out=8); input NCHW = (2, 4, 16, 16)
    N, Cin, Cout, H, W = 2, 4, 8, 16, 16

    key = jax.random.PRNGKey(0)
    kx, kw, kb = jax.random.split(key, 3)

    x = jax.random.normal(kx, (N, Cin, H, W), dtype=jnp.float32)

    # Deterministic PyTorch-Conv2d-like init: uniform(-bound, bound), bound = 1/sqrt(fan_in)
    fan_in = Cin * 3 * 3
    bound = 1.0 / jnp.sqrt(jnp.float32(fan_in))
    weight = jax.random.uniform(kw, (Cout, Cin, 3, 3), jnp.float32,
                                minval=-bound, maxval=bound)
    bias = jax.random.uniform(kb, (Cout,), jnp.float32,
                              minval=-bound, maxval=bound)

    out = conv_relu(x, weight, bias)
    out = jax.block_until_ready(out)

    # Cross-check against the XLA reference convolution.
    ref = jax.lax.conv_general_dilated(
        x, weight, window_strides=(1, 1), padding=((1, 1), (1, 1)),
        dimension_numbers=("NCHW", "OIHW", "NCHW"))
    ref = jnp.maximum(ref + bias[None, :, None, None], 0.0)
    assert out.shape == (N, Cout, H, W)
    assert jnp.allclose(out, ref, atol=1e-4, rtol=1e-4)

    print("KERNEL_OK")
</pallas_src>

<mosaic_0001>
module attributes {stable_mosaic.version = 11 : i64} {
  func.func @conv3x3_relu_kernel(%arg0: i32, %arg1: memref<1x4x256xf32, #tpu.memory_space<vmem>>, %arg2: memref<8x36xf32, #tpu.memory_space<vmem>>, %arg3: memref<8x1xf32, #tpu.memory_space<vmem>>, %arg4: memref<9x256xf32, #tpu.memory_space<vmem>>, %arg5: memref<1x8x256xf32, #tpu.memory_space<vmem>>) attributes {dimension_semantics = [#tpu.dimension_semantics<parallel>], iteration_bounds = array<i64: 2>, scalar_prefetch = 0 : i64, scratch_operands = 0 : i64, tpu.core_type = #tpu.core_type<tc>, window_params = [{transform_indices = @transform_0, window_bounds = array<i64: 1, 4, 256>}, {pipeline_mode = #tpu.pipeline_mode<synchronous>, transform_indices = @transform_1, window_bounds = array<i64: 8, 36>}, {pipeline_mode = #tpu.pipeline_mode<synchronous>, transform_indices = @transform_2, window_bounds = array<i64: 8, 1>}, {pipeline_mode = #tpu.pipeline_mode<synchronous>, transform_indices = @transform_3, window_bounds = array<i64: 9, 256>}, {transform_indices = @transform_4, window_bounds = array<i64: 1, 8, 256>}]} {
    %c0 = arith.constant 0 : index
    %c0_0 = arith.constant 0 : index
    %c0_1 = arith.constant 0 : index
    %0 = vector.load %arg1[%c0, %c0_0, %c0_1] : memref<1x4x256xf32, #tpu.memory_space<vmem>>, vector<1x4x256xf32>
    %1 = vector.shape_cast %0 : vector<1x4x256xf32> to vector<4x256xf32>
    %2 = vector.extract_strided_slice %1 {offsets = [0, 239], sizes = [4, 17], strides = [1, 1]} : vector<4x256xf32> to vector<4x17xf32>
    %3 = vector.extract_strided_slice %1 {offsets = [0, 0], sizes = [4, 239], strides = [1, 1]} : vector<4x256xf32> to vector<4x239xf32>
    %4 = tpu.concatenate %2, %3 in 1 : vector<4x17xf32>, vector<4x239xf32> -> vector<4x256xf32>
    %c0_2 = arith.constant 0 : index
    %c0_3 = arith.constant 0 : index
    %5 = vector.load %arg4[%c0_2, %c0_3] : memref<9x256xf32, #tpu.memory_space<vmem>>, vector<1x256xf32>
    %6 = vector.broadcast %5 : vector<1x256xf32> to vector<4x256xf32>
    %7 = arith.mulf %4, %6 : vector<4x256xf32>
    %8 = vector.extract_strided_slice %1 {offsets = [0, 240], sizes = [4, 16], strides = [1, 1]} : vector<4x256xf32> to vector<4x16xf32>
    %9 = vector.extract_strided_slice %1 {offsets = [0, 0], sizes = [4, 240], strides = [1, 1]} : vector<4x256xf32> to vector<4x240xf32>
    %10 = tpu.concatenate %8, %9 in 1 : vector<4x16xf32>, vector<4x240xf32> -> vector<4x256xf32>
    %c1 = arith.constant 1 : index
    %c0_4 = arith.constant 0 : index
    %11 = vector.load %arg4[%c1, %c0_4] : memref<9x256xf32, #tpu.memory_space<vmem>>, vector<1x256xf32>
    %12 = vector.broadcast %11 : vector<1x256xf32> to vector<4x256xf32>
    %13 = arith.mulf %10, %12 : vector<4x256xf32>
    %14 = vector.extract_strided_slice %1 {offsets = [0, 241], sizes = [4, 15], strides = [1, 1]} : vector<4x256xf32> to vector<4x15xf32>
    %15 = vector.extract_strided_slice %1 {offsets = [0, 0], sizes = [4, 241], strides = [1, 1]} : vector<4x256xf32> to vector<4x241xf32>
    %16 = tpu.concatenate %14, %15 in 1 : vector<4x15xf32>, vector<4x241xf32> -> vector<4x256xf32>
    %c2 = arith.constant 2 : index
    %c0_5 = arith.constant 0 : index
    %17 = vector.load %arg4[%c2, %c0_5] : memref<9x256xf32, #tpu.memory_space<vmem>>, vector<1x256xf32>
    %18 = vector.broadcast %17 : vector<1x256xf32> to vector<4x256xf32>
    %19 = arith.mulf %16, %18 : vector<4x256xf32>
    %20 = vector.extract_strided_slice %1 {offsets = [0, 255], sizes = [4, 1], strides = [1, 1]} : vector<4x256xf32> to vector<4x1xf32>
    %21 = vector.extract_strided_slice %1 {offsets = [0, 0], sizes = [4, 255], strides = [1, 1]} : vector<4x256xf32> to vector<4x255xf32>
    %22 = tpu.concatenate %20, %21 in 1 : vector<4x1xf32>, vector<4x255xf32> -> vector<4x256xf32>
    %c3 = arith.constant 3 : index
    %c0_6 = arith.constant 0 : index
    %23 = vector.load %arg4[%c3, %c0_6] : memref<9x256xf32, #tpu.memory_space<vmem>>, vector<1x256xf32>
    %24 = vector.broadcast %23 : vector<1x256xf32> to vector<4x256xf32>
    %25 = arith.mulf %22, %24 : vector<4x256xf32>
    %26 = vector.extract_strided_slice %1 {offsets = [0, 1], sizes = [4, 255], strides = [1, 1]} : vector<4x256xf32> to vector<4x255xf32>
    %27 = vector.extract_strided_slice %1 {offsets = [0, 0], sizes = [4, 1], strides = [1, 1]} : vector<4x256xf32> to vector<4x1xf32>
    %28 = tpu.concatenate %26, %27 in 1 : vector<4x255xf32>, vector<4x1xf32> -> vector<4x256xf32>
    %c5 = arith.constant 5 : index
    %c0_7 = arith.constant 0 : index
    %29 = vector.load %arg4[%c5, %c0_7] : memref<9x256xf32, #tpu.memory_space<vmem>>, vector<1x256xf32>
    %30 = vector.broadcast %29 : vector<1x256xf32> to vector<4x256xf32>
    %31 = arith.mulf %28, %30 : vector<4x256xf32>
    %32 = vector.extract_strided_slice %1 {offsets = [0, 15], sizes = [4, 241], strides = [1, 1]} : vector<4x256xf32> to vector<4x241xf32>
    %33 = vector.extract_strided_slice %1 {offsets = [0, 0], sizes = [4, 15], strides = [1, 1]} : vector<4x256xf32> to vector<4x15xf32>
    %34 = tpu.concatenate %32, %33 in 1 : vector<4x241xf32>, vector<4x15xf32> -> vector<4x256xf32>
    %c6 = arith.constant 6 : index
    %c0_8 = arith.constant 0 : index
    %35 = vector.load %arg4[%c6, %c0_8] : memref<9x256xf32, #tpu.memory_space<vmem>>, vector<1x256xf32>
    %36 = vector.broadcast %35 : vector<1x256xf32> to vector<4x256xf32>
    %37 = arith.mulf %34, %36 : vector<4x256xf32>
    %38 = vector.extract_strided_slice %1 {offsets = [0, 16], sizes = [4, 240], strides = [1, 1]} : vector<4x256xf32> to vector<4x240xf32>
    %39 = vector.extract_strided_slice %1 {offsets = [0, 0], sizes = [4, 16], strides = [1, 1]} : vector<4x256xf32> to vector<4x16xf32>
    %40 = tpu.concatenate %38, %39 in 1 : vector<4x240xf32>, vector<4x16xf32> -> vector<4x256xf32>
    %c7 = arith.constant 7 : index
    %c0_9 = arith.constant 0 : index
    %41 = vector.load %arg4[%c7, %c0_9] : memref<9x256xf32, #tpu.memory_space<vmem>>, vector<1x256xf32>
    %42 = vector.broadcast %41 : vector<1x256xf32> to vector<4x256xf32>
    %43 = arith.mulf %40, %42 : vector<4x256xf32>
    %44 = vector.extract_strided_slice %1 {offsets = [0, 17], sizes = [4, 239], strides = [1, 1]} : vector<4x256xf32> to vector<4x239xf32>
    %45 = vector.extract_strided_slice %1 {offsets = [0, 0], sizes = [4, 17], strides = [1, 1]} : vector<4x256xf32> to vector<4x17xf32>
    %46 = tpu.concatenate %44, %45 in 1 : vector<4x239xf32>, vector<4x17xf32> -> vector<4x256xf32>
    %c8 = arith.constant 8 : index
    %c0_10 = arith.constant 0 : index
    %47 = vector.load %arg4[%c8, %c0_10] : memref<9x256xf32, #tpu.memory_space<vmem>>, vector<1x256xf32>
    %48 = vector.broadcast %47 : vector<1x256xf32> to vector<4x256xf32>
    %49 = arith.mulf %46, %48 : vector<4x256xf32>
    %50 = tpu.concatenate %7, %13, %19, %25, %1, %31, %37, %43, %49 in 0 : vector<4x256xf32>, vector<4x256xf32>, vector<4x256xf32>, vector<4x256xf32>, vector<4x256xf32>, vector<4x256xf32>, vector<4x256xf32>, vector<4x256xf32>, vector<4x256xf32> -> vector<36x256xf32>
    %c0_11 = arith.constant 0 : index
    %c0_12 = arith.constant 0 : index
    %51 = vector.load %arg2[%c0_11, %c0_12] : memref<8x36xf32, #tpu.memory_space<vmem>>, vector<8x36xf32>
    %cst = arith.constant dense<0.000000e+00> : vector<8x256xf32>
    %52 = tpu.matmul %51, %50, %cst {dimension_numbers = #tpu.dot_dimension_numbers<[1], [0], [0], [1], [0, 0, 1, 1], [], []>} : vector<8x36xf32>, vector<36x256xf32>, vector<8x256xf32> -> vector<8x256xf32>
    %c0_13 = arith.constant 0 : index
    %c0_14 = arith.constant 0 : index
    %53 = vector.load %arg3[%c0_13, %c0_14] : memref<8x1xf32, #tpu.memory_space<vmem>>, vector<8x1xf32>
    %54 = vector.broadcast %53 : vector<8x1xf32> to vector<8x256xf32>
    %55 = arith.addf %52, %54 : vector<8x256xf32>
    %cst_15 = arith.constant 0.000000e+00 : f32
    %56 = vector.broadcast %cst_15 : f32 to vector<8x256xf32>
    %57 = arith.maximumf %55, %56 : vector<8x256xf32>
    %c0_16 = arith.constant 0 : index
    %c0_17 = arith.constant 0 : index
    %c0_18 = arith.constant 0 : index
    %58 = vector.load %arg5[%c0_16, %c0_17, %c0_18] : memref<1x8x256xf32, #tpu.memory_space<vmem>>, vector<1x8x256xf32>
    %59 = vector.shape_cast %58 : vector<1x8x256xf32> to vector<8x256xf32>
    %60 = vector.shape_cast %57 : vector<8x256xf32> to vector<1x8x256xf32>
    tpu.vector_store %arg5[%c0_16, %c0_17, %c0_18], %60 {strides = array<i32>} : memref<1x8x256xf32, #tpu.memory_space<vmem>>, vector<1x8x256xf32>,
    return
  }
  func.func @transform_0(%arg0: i32) -> (i32, i32, i32) {
    %c0_i32 = arith.constant 0 : i32
    %c0_i32_0 = arith.constant 0 : i32
    %c0_i32_1 = arith.constant 0 : i32
    return %arg0, %c0_i32, %c0_i32_0 : i32, i32, i32
  }
  func.func @transform_1(%arg0: i32) -> (i32, i32) {
    %c0_i32 = arith.constant 0 : i32
    %c0_i32_0 = arith.constant 0 : i32
    %c0_i32_1 = arith.constant 0 : i32
    return %c0_i32, %c0_i32_0 : i32, i32
  }
  func.func @transform_2(%arg0: i32) -> (i32, i32) {
    %c0_i32 = arith.constant 0 : i32
    %c0_i32_0 = arith.constant 0 : i32
    %c0_i32_1 = arith.constant 0 : i32
    return %c0_i32, %c0_i32_0 : i32, i32
  }
  func.func @transform_3(%arg0: i32) -> (i32, i32) {
    %c0_i32 = arith.constant 0 : i32
    %c0_i32_0 = arith.constant 0 : i32
    %c0_i32_1 = arith.constant 0 : i32
    return %c0_i32, %c0_i32_0 : i32, i32
  }
  func.func @transform_4(%arg0: i32) -> (i32, i32, i32) {
    %c0_i32 = arith.constant 0 : i32
    %c0_i32_0 = arith.constant 0 : i32
    %c0_i32_1 = arith.constant 0 : i32
    return %arg0, %c0_i32, %c0_i32_0 : i32, i32, i32
  }
}

</mosaic_0001>

<bundles_post_ra>
// kernel: tpu_custom_call.1
= control target key start
LH: loop header
LB: loop body
LE: loop exit
PB: predicated region body
PF: predicated region fallthrough
CT: control target
= control target key end

     0   :  { %9 = vsyncpa [#allocation3], 0  ;;  %s1183_s0 = inlined_call_operand.hbm [shape: f32[2,4,256], index: 0, kind: input, shape index: {}]   ;;  %s1184_s1 = inlined_call_operand.vmem [shape: f32[8,36], index: 1, kind: input, shape index: {}]   ;;  %s1185_s2 = inlined_call_operand.vmem [shape: f32[8,1], index: 2, kind: input, shape index: {}]   ;;  %s1186_s3 = inlined_call_operand.hbm [shape: f32[9,256], index: 3, kind: input, shape index: {}]   ;;  %s1187_s4 = inlined_call_operand.hbm [shape: f32[2,8,256], index: 4, kind: output, shape index: {}]  }
   0x1   :  { %11 = vsyncpa [#allocation3 + $0x1], 0 }
   0x2   :  { %12 = vsyncpa [#allocation6], 0 }
   0x3   :  { %13 = vsyncpa [#allocation4], 0 }
   0x4   :  { %15 = vsyncpa [#allocation4 + $0x1], 0  ;;  %s922_s15 = smov 0   ;;  %s924_s16 = smov 0  }
   0x5   :  { %s926_s17 = smov 0   ;;  %s928_s18 = smov 0  }
   0x6 LB: > { %s943_s19 = sadd.s32 4294967295, %s880_s18   ;;  %s652_s20 = sadd.s32 4294967294, %s880_s18   ;;  %s880_s18 = sphi %s928_s18, %s1207_s18   ;;  %s876_s17 = sphi %s926_s17, %s1206_s17   ;;  %s872_s16 = sphi %s924_s16, %s1205_s16   ;;  %s868_s15 = sphi %s922_s15, %s1204_s15  }
   0x7   : > { %p41_p0 = scmp.ne.s32.totalorder %s872_s16, %s868_s15  ;;  %p1188_p1 = scmp.eq.s32.totalorder %s943_s19, 0 }
   0x8   : > { %p134_p3 = scmp.eq.s32.totalorder %s652_s20, 1  ;;  %p653_p5 = scmp.ge.s32.totalorder %s880_s18, 1 }
   0x9   : > { %p952_p4 = por %p1188_p1, %p41_p0  ;;  %p141_p7 = scmp.lt.s32.totalorder %s880_s18, 3 }
   0xa   : > { %p957_p6 = por %p134_p3, %p41_p0  ;;  %s882_s24 = smov [#allocation5]  }
   0xb   : > { %s1191_s21 = scalar_select %p952_p4, 1, 0 }
   0xc   : > { %s1192_s22 = scalar_select %p957_p6, 1, 0 }
   0xd   : > { %p962_p8 = pnand %p653_p5, %p141_p7  ;;  %s159_s25 = sshll.u32 %s882_s24, 4  ;;  %s966_s25 = int_to_ptr.vmem [resolvable:$true] %s159_s25 }
   0xe   : > { %s978_s27 = sadd.s32 1, %s880_s18   ;;  %s28_s28 = sadd.s32 1, %s876_s17 }
   0xf   : > { %s1193_s23 = scalar_select %p962_p8, 1, 0 }
  0x10   : > { %p689_p9 = pneg %p962_p8  ;;  %s25_s29 = ssub.s32 %s880_s18, %s978_s27 }
  0x11   : > { %s752_s6 = scalar_lea.hbm %s1186_s3, 512 }
  0x12   : > { %p973_p11 = pnand %p689_p9, %p1188_p1  ;;  %p753_p12 = scmp.ne.s32.totalorder %s1186_s3, %s752_s6 }
  0x13   : > { %p759_p5 = scmp.lt.u32.totalorder %s752_s6, %s1186_s3 }
  0x14   : > { %p754_p13 = pneg %p973_p11 }
  0x16   : > { %p755_p0 = pnand %p754_p13, %p753_p12 }
  0x18   : > { %p756_p3 = pneg %p755_p0 }
  0x1a   : > { %p761_p7 = pnand %p759_p5, %p756_p3 }
  0x1c   : > { %764 = shalt.err (!%p761_p7)
}
  0x1d   : > { %s765_s11 = scalar_lea.vmem %s966_s25, 512  ;;  %p773_p2 = scmp.lt.s32.totalorder %s966_s25, %s966_s25 }
  0x1e   : > { %p766_p9 = scmp.ne.s32.totalorder %s966_s25, %s765_s11  ;;  %p774_p6 = scmp.lt.s32.totalorder %s765_s11, %s765_s11 }
  0x20   : > { %p768_p10 = pnand %p766_p9, %p754_p13  ;;  %p775_p4 = por %p774_p6, %p773_p2 }
  0x22   : > { %p769_p1 = pneg %p768_p10 }
  0x24   : > { %p776_p8 = pnand %p775_p4, %p769_p1 }
  0x26   : > { %779 = shalt.err (!%p776_p8)
}
  0x27   : > { %s883_s12 = smov 256   ;;  %s884_s13 = smov 16  }
  0x28   : > { %692 = dma.hbm_to_vmem [thread:$0]  (!%p973_p11), %s1186_s3, 512, %s966_s25, [#allocation6], %s883_s12, %s883_s12, %s884_s13  }
  0x29   : > { %p26_p2 = scmp.eq.s32.totalorder %s25_s29, 0  ;;  %p35_p1 = scmp.ne.s32.totalorder %s876_s17, %s872_s16 }
  0x2a   : > { %p36_p4 = scmp.eq.s32.totalorder %s880_s18, 0  ;;  %p702_p6 = scmp.lt.s32.totalorder %s880_s18, 2 }
  0x2b   : > { %s1009_s24 = scalar_select %p26_p2, %s876_s17, %s28_s28  }
  0x2c   : > { %p37_p8 = por %p36_p4, %p35_p1  ;;  %p1195_p10 = scmp.eq.s32.totalorder %s943_s19, 1 }
  0x2d   : > { %s173_s5 = sand.u32 1, %s876_s17   ;;  %s671_s6 = sshll.u32 %s880_s18, 7 }
  0x2e   : > { %p1013_p12 = por %p1195_p10, %p35_p1  ;;  %s656_s7 = sshll.u32 %s173_s5, 3 }
  0x2f   : > { %s1022_s9 = scalar_lea.hbm %s1183_s0, %s671_s6  ;;  %s177_s25 = scalar_lea.vmem [#allocation2], %s656_s7 }
  0x30   : > { %s185_s28 = sshll.u32 %s177_s25, 4  ;;  %p1024_p11 = pnand %p702_p6, %p37_p8  ;;  %s1028_s28 = int_to_ptr.vmem [resolvable:$true] %s185_s28 }
  0x31   : > { %s174_s10 = scalar_lea.sflag [#allocation3], %s173_s5  ;;  %s780_s11 = scalar_lea.hbm %s1022_s9, 128 }
  0x32   : > { %p781_p13 = scmp.ne.s32.totalorder %s1022_s9, %s780_s11  ;;  %p782_p0 = pneg %p1024_p11 }
  0x33   : > { %s785_s14 = scalar_lea.hbm %s1183_s0, 256  ;;  %p786_p7 = scmp.lt.u32.totalorder %s1022_s9, %s1183_s0 }
  0x34   : > { %p783_p3 = pnand %p782_p0, %p781_p13  ;;  %p787_p9 = scmp.lt.u32.totalorder %s785_s14, %s780_s11 }
  0x35   : > { %p789_p1 = scmp.lt.u32.totalorder %s780_s11, %s1022_s9 }
  0x36   : > { %p784_p5 = pneg %p783_p3  ;;  %p788_p2 = por %p787_p9, %p786_p7 }
  0x38   : > { %p790_p4 = por %p789_p1, %p788_p2 }
  0x3a   : > { %p791_p6 = pnand %p790_p4, %p784_p5 }
  0x3c   : > { %794 = shalt.err (!%p791_p6)
}
  0x3d   : > { %s795_s5 = scalar_lea.vmem %s1028_s28, 128  ;;  %s885_s7 = smov [#allocation2]  }
  0x3e   : > { %p796_p8 = scmp.ne.s32.totalorder %s1028_s28, %s795_s5  ;;  %s800_s26 = sshll.u32 %s885_s7, 4  ;;  %s801_s26 = int_to_ptr.vmem [resolvable:$false] %s800_s26 }
  0x3f   : > { %s802_s8 = scalar_lea.vmem %s801_s26, 256  ;;  %p803_p3 = scmp.lt.s32.totalorder %s1028_s28, %s801_s26 }
  0x40   : > { %p798_p10 = pnand %p796_p8, %p782_p0  ;;  %p804_p7 = scmp.lt.s32.totalorder %s802_s8, %s795_s5 }
  0x42   : > { %p799_p13 = pneg %p798_p10  ;;  %p805_p9 = por %p804_p7, %p803_p3 }
  0x44   : > { %p806_p2 = pnand %p805_p9, %p799_p13 }
  0x46   : > { %809 = shalt.err (!%p806_p2)
}
  0x47   : > { %696 = dma.hbm_to_vmem [thread:$0]  (!%p1024_p11), %s1022_s9, 128, %s1028_s28, %s174_s10  }
  0x48   : > { %p1198_p5 = scmp.ne.s32.totalorder %s1193_s23, 0 }
  0x49   : > { %s1058_s25 = sand.u32 (!%p1198_p5), 1, %s872_s16   ;;  %p1199_p0 = scmp.ne.s32.totalorder (!%p1198_p5), %s1191_s21, 0 }
  0x4a   : > { %194 = sbr.rel (%p1198_p5) target bundleno = 468 (0x1d4), region = 36  ;;  %s660_s11 = sshll.u32 (!%p1198_p5), %s1058_s25, 3 }
  0x4b   : > { %s197_s12 = scalar_lea.sflag (!%p1198_p5), [#allocation3], %s1058_s25  ;;  %s200_s13 = scalar_lea.vmem (!%p1198_p5), [#allocation2], %s660_s11 }
  0x51   : > { %855 = dma.done.wait (%p1199_p0), %s197_s12, 128  }
  0x52   : > { %857 = vsyncadd (%p1199_p0), %s197_s12, 4294967168  ;;  %p1200_p1 = scmp.eq.s32.totalorder %s943_s19, 0 }
  0x54   : > { %859 = dma.done.wait (%p1200_p1), [#allocation6], 512   ;;  %p1201_p11 = pmov %p1200_p1 }
  0x55   : > { %v1070_v0 = vld [vmem:[%s200_s13] sm:$0xff]  ;;  %s886_s23 = smov 1   ;;  %s887_s9 = smov 16   ;;  %v892_v2 = vmov 0.0   ;;  %v894_v3 = vmov 0   ;;  %v244_v5 = vlaneseq  ;;  %vm261_vm0 = vcmask 130048  }
  0x56   : > { %861 = vsyncadd (%p1201_p11), [#allocation6], 4294966784  ;;  %309 = vrot.lane.b32.xlu1 %v1070_v0, %s886_s23  ;;  %259 = vrot.lane.b32.xlu0 %v1070_v0, %s887_s9  ;;  %v1076_v1 = vcombine.high %v1070_v0, %v1070_v0  ;;  %s888_s21 = smov 17   ;;  %s889_s28 = smov 15   ;;  %v466_v4 = vld [vmem:[%s1185_s2] sm:$0xff]  ;;  %vm311_vm1 = vcmask 7168  }
  0x57   : > { %s890_s29 = smov 127   ;;  %s891_s10 = smov 112   ;;  %546 = vmatprep.mubr.f32.mxu0 %v892_v2  ;;  %750 = vset.pattern.permute.xlu0 %v894_v3  ;;  %v245_v6 = vshrl.u32 %v244_v5, 7  ;;  %v267_v11 = vld [vmem:[#allocation5 + $0x1] ss:$8 sm:$0x3] }
  0x58   : > { %s893_s14 = smov 113   ;;  %s895_s20 = smov 111   ;;  %v317_v12 = vld [vmem:[#allocation5 + $0x3] ss:$8 sm:$0x3]  ;;  %vm237_vm2 = vcmask 138240  }
  0x59   : > { %v1095_v9 = vsub.s32 0, %v245_v6  ;;  %v1097_v10 = vsub.s32 1, %v245_v6  ;;  %v242_v19 = vld [vmem:[#allocation5] ss:$8 sm:$0x3]  ;;  %vm286_vm3 = vcmask 121856  }
  0x5a   : > { %235 = vrot.lane.b32.xlu1 %v1070_v0, %s888_s21  ;;  %256 = vrot.lane.b32.xlu0 %v1076_v1, %s887_s9  ;;  %v292_v22 = vld [vmem:[#allocation5 + $0x2] ss:$8 sm:$0x3]  ;;  %vm335_vm4 = vcmask 1039360   ;;  %vm456_vm5 = vcmask 1043456   ;;  %vm385_vm6 = vcmask 916480  }
  0x5b   : > { %v272_v14 = vrot.slane %v267_v11, %v1095_v9  ;;  %v276_v15 = vrot.slane %v267_v11, %v1097_v10  ;;  %v322_v20 = vrot.slane %v317_v12, %v1095_v9  ;;  %v326_v21 = vrot.slane %v317_v12, %v1097_v10  ;;  %v342_v41 = vld [vmem:[#allocation5 + $0x5] ss:$8 sm:$0x3]  ;;  %v392_v52 = vld [vmem:[#allocation5 + $0x7] ss:$8 sm:$0x3] }
  0x5c   : > { %v247_v26 = vrot.slane %v242_v19, %v1095_v9  ;;  %v251_v27 = vrot.slane %v242_v19, %v1097_v10  ;;  %v297_v35 = vrot.slane %v292_v22, %v1095_v9  ;;  %v301_v36 = vrot.slane %v292_v22, %v1097_v10  ;;  %v367_v3 = vld [vmem:[#allocation5 + $0x6] ss:$8 sm:$0x3]  ;;  %s662_s8 = sshll.u32 %s1058_s25, 4  ;;  %s672_s11 = sshll.u32 %s943_s19, 8 }
  0x5d   : > { %v347_v50 = vrot.slane %v342_v41, %v1095_v9  ;;  %v351_v51 = vrot.slane %v342_v41, %v1097_v10  ;;  %v397_v63 = vrot.slane %v392_v52, %v1095_v9  ;;  %v401_v2 = vrot.slane %v392_v52, %v1097_v10  ;;  %s228_s12 = scalar_lea.vmem [#allocation7], %s662_s8  ;;  %s896_s19 = smov [#allocation7]  }
  0x5e   : > { %306 = vrot.lane.b32.xlu1 %v1076_v1, %s886_s23  ;;  %232 = vrot.lane.b32.xlu0 %v1076_v1, %s888_s21  ;;  %vm360_vm7 = vcmask 924672   ;;  %vm410_vm8 = vcmask 908288   ;;  %vm472_vm9 = vcmask 293888   ;;  %s572_s13 = sshll.u32 %s228_s12, 4  ;;  %s1139_s21 = scalar_lea.hbm %s1187_s4, %s672_s11  ;;  %s1141_s13 = int_to_ptr.vmem [resolvable:$true] %s572_s13 }
  0x62   : > { %284 = vrot.lane.b32.xlu1 %v1070_v0, %s889_s28  ;;  %281 = vrot.lane.b32.xlu0 %v1076_v1, %s889_s28  ;;  %s558_s28 = scalar_lea.sflag [#allocation4], %s1058_s25 }
  0x66   : > { %333 = vrot.lane.b32.xlu1 %v1076_v1, %s890_s29  ;;  %331 = vrot.lane.b32.xlu0 %v1070_v0, %s890_s29  ;;  %s810_s29 = scalar_lea.vmem %s1141_s13, 256 }
  0x67   : > { %p811_p4 = scmp.ne.s32.totalorder %s1141_s13, %s810_s29 }
  0x69   : > { %p812_p6 = pnand %p811_p4, %p1013_p12 }
  0x6a   : > { %383 = vrot.lane.b32.xlu1 %v1076_v1, %s891_s10  ;;  %381 = vrot.lane.b32.xlu0 %v1070_v0, %s891_s10  ;;  %s814_s10 = sshll.u32 %s896_s19, 4  ;;  %s815_s10 = int_to_ptr.vmem [resolvable:$false] %s814_s10 }
  0x6b   : > { %p813_p8 = pneg %p812_p6  ;;  %p817_p10 = scmp.lt.s32.totalorder %s1141_s13, %s815_s10 }
  0x6e   : > { %358 = vrot.lane.b32.xlu1 %v1076_v1, %s893_s14  ;;  %356 = vrot.lane.b32.xlu0 %v1070_v0, %s893_s14  ;;  %s816_s14 = scalar_lea.vmem %s815_s10, 512 }
  0x6f   : > { %p818_p13 = scmp.lt.s32.totalorder %s816_s14, %s810_s29 }
  0x71   : > { %p819_p3 = por %p818_p13, %p817_p10 }
  0x72   : > { %408 = vrot.lane.b32.xlu1 %v1076_v1, %s895_s20  ;;  %406 = vrot.lane.b32.xlu0 %v1070_v0, %s895_s20 }
  0x73   : > { %p820_p7 = pnand %p819_p3, %p813_p8 }
  0x76   : > { %469 = vperm.xlu0 %750, %v466_v4  }
  0xc8   : > { %v310_v7 = vpop.permute.xlu1 %309  ;;  %v260_v8 = vpop.permute.xlu0 %259 }
  0xcc   : > { %v236_v13 = vpop.permute.xlu1 %235  ;;  %v257_v16 = vpop.permute.xlu0 %256 }
  0xcd   : > { %v262_v17 = vsel %vm261_vm0, %v260_v8, %v257_v16  ;;  %v265_v18 = vsel %vm261_vm0, %v257_v16, %v260_v8  ;;  %v417_v16 = vld [vmem:[#allocation5 + $0x10] ss:$8 sm:$0x3] }
  0xce   : > { %v279_v23 = vmul.f32 %v272_v14, %v265_v18  ;;  %v280_v24 = vmul.f32 %v276_v15, %v262_v17  ;;  %v372_v14 = vrot.slane %v367_v3, %v1095_v9  ;;  %v376_v15 = vrot.slane %v367_v3, %v1097_v10 }
  0xd0   : > { %v307_v25 = vpop.permute.xlu1 %306  ;;  %v233_v28 = vpop.permute.xlu0 %232  ;;  %v433_v42 = vrot.slane %v279_v23, 4  ;;  %v434_v43 = vrot.slane %v280_v24, 4  ;;  %v426_v23 = vrot.slane %v417_v16, %v1097_v10 }
  0xd1   : > { %v312_v29 = vsel %vm311_vm1, %v310_v7, %v307_v25  ;;  %v315_v30 = vsel %vm311_vm1, %v307_v25, %v310_v7  ;;  %v238_v31 = vsel %vm237_vm2, %v236_v13, %v233_v28  ;;  %v241_v32 = vsel %vm237_vm2, %v233_v28, %v236_v13 }
  0xd2   : > { %v329_v33 = vmul.f32 %v322_v20, %v315_v30  ;;  %v330_v34 = vmul.f32 %v326_v21, %v312_v29  ;;  %v254_v37 = vmul.f32 %v247_v26, %v241_v32  ;;  %v255_v38 = vmul.f32 %v251_v27, %v238_v31 }
  0xd3   : > { %v422_v28 = vrot.slane %v417_v16, %v1095_v9 }
  0xd4   : > { %v285_v39 = vpop.permute.xlu1 %284  ;;  %v282_v40 = vpop.permute.xlu0 %281  ;;  %v439_v46 = vrot.slane %v329_v33, 4  ;;  %v440_v47 = vrot.slane %v330_v34, 4  ;;  %v458_v55 = vsel %vm456_vm5, %v255_v38, %v434_v43  ;;  %v457_v57 = vsel %vm456_vm5, %v254_v37, %v433_v42 }
  0xd5   : > { %v287_v44 = vsel %vm286_vm3, %v285_v39, %v282_v40  ;;  %v290_v45 = vsel %vm286_vm3, %v282_v40, %v285_v39 }
  0xd6   : > { %v304_v48 = vmul.f32 %v297_v35, %v290_v45  ;;  %v305_v49 = vmul.f32 %v301_v36, %v287_v44 }
  0xd8   : > { %v334_v53 = vpop.permute.xlu1 %333  ;;  %v332_v54 = vpop.permute.xlu0 %331  ;;  %v460_v56 = vsel %vm456_vm5, %v305_v49, %v440_v47  ;;  %v459_v58 = vsel %vm456_vm5, %v304_v48, %v439_v46 }
  0xd9   : > { %v336_v59 = vsel %vm335_vm4, %v332_v54, %v334_v53  ;;  %v340_v60 = vsel %vm335_vm4, %v334_v53, %v332_v54  ;;  %v673_v61 = vpack.c.bf16 %v460_v56, %v458_v55  ;;  %v675_v62 = vpack.c.bf16 %v459_v58, %v457_v57 }
  0xda   : > { %v354_v4 = vmul.f32 %v347_v50, %v336_v59  ;;  %v355_v5 = vmul.f32 %v351_v51, %v340_v60 }
  0xdb   : > { %674 = vmatprep.subr.bf16.mxu0 %v673_v61 }
  0xdc   : > { %v384_v6 = vpop.permute.xlu1 %383  ;;  %676 = vmatpush1.bf16.msra.mxu0 %v675_v62  ;;  %v382_v7 = vpop.permute.xlu0 %381  ;;  %v446_v17 = vrot.slane %v354_v4, 4  ;;  %v447_v18 = vrot.slane %v355_v5, 4 }
  0xdd   : > { %v386_v8 = vsel %vm385_vm6, %v382_v7, %v384_v6  ;;  %v390_v11 = vsel %vm385_vm6, %v384_v6, %v382_v7 }
  0xde   : > { %v404_v12 = vmul.f32 %v397_v63, %v386_v8  ;;  %v405_v13 = vmul.f32 %v401_v2, %v390_v11  ;;  %v462_v30 = vsel %vm456_vm5, %v1076_v1, %v447_v18  ;;  %v461_v33 = vsel %vm456_vm5, %v1070_v0, %v446_v17  ;;  %v465_v1 = vld [vmem:[%s1184_s1] sm:$0xff] }
  0xe0   : > { %v359_v19 = vpop.permute.xlu1 %358  ;;  %v357_v20 = vpop.permute.xlu0 %356  ;;  %v452_v24 = vrot.slane %v404_v12, 4  ;;  %v453_v25 = vrot.slane %v405_v13, 4 }
  0xe1   : > { %v361_v21 = vsel %vm360_vm7, %v357_v20, %v359_v19  ;;  %v365_v22 = vsel %vm360_vm7, %v359_v19, %v357_v20 }
  0xe2   : > { %v379_v26 = vmul.f32 %v372_v14, %v361_v21  ;;  %v380_v27 = vmul.f32 %v376_v15, %v365_v22 }
  0xe4   : > { %v409_v29 = vpop.permute.xlu1 %408  ;;  %v464_v31 = vsel %vm456_vm5, %v380_v27, %v453_v25  ;;  %v407_v32 = vpop.permute.xlu0 %406  ;;  %v463_v34 = vsel %vm456_vm5, %v379_v26, %v452_v24 }
  0xe5   : > { %v677_v10 = vpack.c.bf16 %v464_v31, %v462_v30  ;;  %v411_v35 = vsel %vm410_vm8, %v407_v32, %v409_v29  ;;  %v415_v36 = vsel %vm410_vm8, %v409_v29, %v407_v32  ;;  %v679_v37 = vpack.c.bf16 %v463_v34, %v461_v33 }
  0xe6   : > { %v430_v38 = vmul.f32 %v426_v23, %v415_v36  ;;  %v429_v9 = vmul.f32 %v422_v28, %v411_v35 }
  0xe7   : > { %678 = vmatprep.subr.bf16.mxu0 %v677_v10 }
  0xe8   : > { %680 = vmatpush1.bf16.msra.mxu0 %v679_v37 }
  0xe9   : > { %663 = vmatprep.subr.msk.mxu0 %vm456_vm5, %v430_v38 }
  0xec   : > { %664 = vmatpush1.msk.msra.mxu0 %vm456_vm5, %v429_v9 }
  0xed   : > { %665 = vmatmul.mubr.msk.f32.vlgmr.msra.gmra.mrb[0].mxu0 %vm472_vm9, %v465_v1 }
  0xf5   : > { %v470_v0 = vpop.permute.xlu0 %469 }
 0x1c0   : > { %v548_v39 = vpop.f32.mrb[0].mxu0 }
 0x1c1   : > { %v549_v40 = vadd.f32 %v548_v39, %v470_v0  ;;  %v550_v41 = vpop.f32.mrb[1].mxu0 }
 0x1c2   : > { %v551_v42 = vadd.f32 %v550_v41, %v470_v0 }
 0x1c3   : > { %v553_v43 = vmax.f32 %v549_v40, 0.0 }
 0x1c4   : > { %v554_v44 = vmax.f32 %v551_v42, 0.0 }
 0x1c5   : > { %555 = vst [vmem:[%s228_s12] sm:$0xff] %v553_v43 }
 0x1c6   : > { %556 = vst [vmem:[%s228_s12 + $0x8] sm:$0xff] %v554_v44 }
 0x1c7   : > { %823 = shalt.err (!%p820_p7)
}
 0x1c8   : > { %s824_s25 = scalar_lea.hbm %s1139_s21, 256  ;;  %s828_s5 = scalar_lea.hbm %s1187_s4, 512 }
 0x1c9   : > { %p825_p9 = scmp.ne.s32.totalorder %s1139_s21, %s824_s25  ;;  %p829_p0 = scmp.lt.u32.totalorder %s1139_s21, %s1187_s4 }
 0x1ca   : > { %p830_p1 = scmp.lt.u32.totalorder %s828_s5, %s824_s25  ;;  %p832_p4 = scmp.lt.u32.totalorder %s824_s25, %s1139_s21 }
 0x1cb   : > { %p826_p2 = pnand %p825_p9, %p1013_p12 }
 0x1cc   : > { %p831_p11 = por %p830_p1, %p829_p0 }
 0x1cd   : > { %p827_p5 = pneg %p826_p2 }
 0x1ce   : > { %p833_p6 = por %p832_p4, %p831_p11 }
 0x1d0   : > { %p834_p8 = pnand %p833_p6, %p827_p5 }
 0x1d2   : > { %837 = shalt.err (!%p834_p8)
}
 0x1d3   : > { %687 = dma.vmem_to_hbm [thread:$0]  (%p1013_p12), %s1141_s13, 256, %s1139_s21, %s558_s28  }
 0x1d4 PF: > { %s584_s8 = sand.u32 1, %s868_s15   ;;  %p1202_p10 = scmp.ne.s32.totalorder %s1192_s22, 0 }
 0x1d5   : > { %p1203_p13 = scmp.ge.s32.totalorder %s880_s18, 2  ;;  %s585_s11 = scalar_lea.sflag [#allocation4], %s584_s8 }
 0x1d7   : > { %p698_p3 = pnand %p1203_p13, %p1202_p10 }
 0x1d9   : > { %863 = dma.done.wait (!%p698_p3), %s585_s11, 256  }
 0x1da   : > { %865 = vsyncadd (!%p698_p3), %s585_s11, 4294967040  ;;  %p18_p7 = scmp.ge.s32.totalorder %s978_s27, 4   ;;  %s1204_s15 = smov %s872_s16 }
 0x1db   : > { %s1205_s16 = smov %s876_s17  ;;  %s1206_s17 = smov %s1009_s24 }
 0x1dc   : > { %s1207_s18 = smov %s978_s27  ;;  %20 = sbr.rel (!%p18_p7) target bundleno = 6 (0x6), region = 92 }
 0x1e3   :  { %590 = vsyncpa [#allocation3], 1 }
 0x1e4   :  { %592 = vsyncpa [#allocation3 + $0x1], 1 }
 0x1e5   :  { %593 = vsyncpa [#allocation6], 1 }
 0x1e6   :  { %594 = vsyncpa [#allocation4], 1 }
 0x1e7   :  { %596 = vsyncpa [#allocation4 + $0x1], 1 }

</bundles_post_ra>
